<compile_context>
chip_gen: v7x
topology: tpu7x:2x2x1
jax: 0.10.0
libtpu: 0.0.40
codegen_flags: <defaults>
</compile_context>

<pallas_src>
import jax
import jax.numpy as jnp
from jax.experimental import pallas as pl
from jax.experimental.pallas import tpu as pltpu


def _stable_mask_kernel(m0_ref, x_ref, res_ref):
    # m0_ref:  (1, TL)  f32 checkerboard row: 1.0 where (row+col) is even
    # x_ref:   (TR, TL) input tile (planes fused along the first axis)
    # res_ref: (2, TR, TL) stacked result tile
    x = x_ref[...].astype(jnp.float32)
    m0 = m0_ref[...]                       # (1, TL) -> sublane-broadcast
    # Multiply (not jnp.where) so NaN/Inf in masked-out cells behave exactly
    # like PyTorch's x * bool_mask.
    res_ref[0, :, :] = x * m0
    res_ref[1, :, :] = x * (1.0 - m0)


def _target_in_elems():
    # ~2 MiB of f32 input per grid step amortizes the ~0.35 us/step overhead
    # on v5e/v6e; bump to ~4 MiB on v7x-class HBM (~3.2 TB/s) where a small
    # step would otherwise be overhead-dominated.
    target = 1 << 19
    try:
        kind = jax.devices()[0].device_kind.lower()
        if "v7" in kind:
            target = 1 << 20
    except Exception:
        pass
    return target


def _choose_tiles(rows, rw, target):
    """Pick (TR, TL): TR multiple of 8 (or == rows), TL multiple of 128 (or == rw)."""
    if rows * rw <= target:
        tr, tl = rows, rw
    elif rw <= target // 8:
        # Full-width rows; tile only the row (sublane) axis.
        tr = (target // rw) // 8 * 8
        tr = rows if tr >= rows else tr
        tl = rw
    else:
        # Per-row footprint too large: tile the lane axis as well.
        tr = 8 if rows >= 8 else rows
        tl = max(128, (target // tr) // 128 * 128)
        tl = rw if tl >= rw else tl
    # Keep >= 2 grid steps for mid/large problems so the 'parallel' axes can
    # shard across both TensorCores on v7x (negligible cost on 1-TC chips).
    if (pl.cdiv(rows, tr) * pl.cdiv(rw, tl) == 1
            and rows >= 16 and rows * rw >= (1 << 16)):
        tr = (rows // 2 + 7) // 8 * 8
    return tr, tl


def stable_mask(x: jax.Array):
    b, c, h, w = x.shape
    bc, hw = b * c, h * w

    # Checkerboard pattern for one (h, w) plane: 1.0 where (row+col) is even.
    r = jnp.arange(h, dtype=jnp.int32)[:, None]
    co = jnp.arange(w, dtype=jnp.int32)[None, :]
    even = ((r + co) & 1) == 0                        # (h, w) bool
    m0_plane = even.reshape(hw).astype(jnp.float32)   # (hw,)

    # Lane-sparse planes: fuse k whole planes per row so the last (lane) dim
    # stays dense; the pattern is identical in every plane so it just tiles.
    k = 1
    if hw < 512:
        for cand in range(min(bc, max(1, 4096 // hw)), 0, -1):
            if bc % cand == 0:
                k = cand
                break
    rows, rw = bc // k, k * hw
    x_flat = x.reshape(rows, rw)
    m0_row = jnp.tile(m0_plane, k).reshape(1, rw)

    tr, tl = _choose_tiles(rows, rw, _target_in_elems())
    # Lane axis slowest so the pattern block index is constant along the fast
    # (row) axis and its DMA is elided after the first fetch.
    grid = (pl.cdiv(rw, tl), pl.cdiv(rows, tr))

    # Actual double-buffered footprint (+ headroom), capped portably.
    x_block = tr * tl * 4
    out_block = 2 * tr * tl * 4
    m_block = tl * 4
    vmem_bytes = int(min(48 << 20,
                         max(8 << 20,
                             2 * (x_block + out_block + m_block) + (2 << 20))))

    res_flat = pl.pallas_call(
        _stable_mask_kernel,
        out_shape=jax.ShapeDtypeStruct((2, rows, rw), jnp.float32),
        grid_spec=pltpu.PrefetchScalarGridSpec(
            num_scalar_prefetch=0,
            grid=grid,
            in_specs=[
                pl.BlockSpec((1, tl), lambda j, i: (0, j)),    # pattern row
                pl.BlockSpec((tr, tl), lambda j, i: (i, j)),   # x
            ],
            out_specs=pl.BlockSpec((2, tr, tl), lambda j, i: (0, i, j)),
        ),
        compiler_params=pltpu.CompilerParams(
            dimension_semantics=("parallel", "parallel"),
            vmem_limit_bytes=vmem_bytes,
        ),
    )(m0_row, x_flat)

    res = res_flat.reshape(2, b, c, h, w)

    # Masks carry no information that depends on x -> build them in JAX
    # (single (h, w) pattern broadcast; no kernel HBM traffic).
    masks = jnp.broadcast_to(
        jnp.stack([even, ~even])[:, None, None, :, :], (2, b, c, h, w)
    )
    return res, masks


def _reference(x):
    b, c, h, w = x.shape
    row = jnp.arange(h)[:, None]
    col = jnp.arange(w)[None, :]
    even = ((row + col) % 2) == 0
    m0 = jnp.broadcast_to(even, x.shape)
    m1 = jnp.broadcast_to(~even, x.shape)
    res = jnp.stack([x * m0, x * m1], axis=0).astype(jnp.float32)
    masks = jnp.stack([m0, m1], axis=0)
    return res, masks


if __name__ == "__main__":
    key = jax.random.PRNGKey(0)
    k1, k2 = jax.random.split(key)

    b, c, h, w = 2, 4, 16, 16
    x = jax.random.normal(k1, (b, c, h, w), dtype=jnp.float32)

    res, masks = stable_mask(x)
    res = jax.block_until_ready(res)
    masks = jax.block_until_ready(masks)

    ref_res, ref_masks = _reference(x)
    assert res.shape == (2, b, c, h, w) and res.dtype == jnp.float32
    assert masks.shape == (2, b, c, h, w) and masks.dtype == jnp.bool_
    assert jnp.allclose(res, ref_res)
    assert jnp.array_equal(masks, ref_masks)

    # Extra tiny check: odd spatial dims / non-128-multiple lane width.
    x2 = jax.random.normal(k2, (1, 3, 7, 6), dtype=jnp.float32)
    res2, masks2 = stable_mask(x2)
    res2 = jax.block_until_ready(res2)
    ref_res2, ref_masks2 = _reference(x2)
    assert jnp.allclose(res2, ref_res2)
    assert jnp.array_equal(masks2, ref_masks2)

    print("KERNEL_OK")
</pallas_src>

<mosaic_0001>
module attributes {stable_mosaic.version = 11 : i64} {
  func.func @_stable_mask_kernel(%arg0: i32, %arg1: i32, %arg2: memref<1x2048xf32, #tpu.memory_space<vmem>>, %arg3: memref<1x2048xf32, #tpu.memory_space<vmem>>, %arg4: memref<2x1x2048xf32, #tpu.memory_space<vmem>>) attributes {dimension_semantics = [#tpu.dimension_semantics<parallel>, #tpu.dimension_semantics<parallel>], iteration_bounds = array<i64: 1, 1>, scalar_prefetch = 0 : i64, scratch_operands = 0 : i64, tpu.core_type = #tpu.core_type<tc>, window_params = [{transform_indices = @transform_0, window_bounds = array<i64: 1, 2048>}, {transform_indices = @transform_1, window_bounds = array<i64: 1, 2048>}, {transform_indices = @transform_2, window_bounds = array<i64: 2, 1, 2048>}]} {
    %c0 = arith.constant 0 : index
    %c0_0 = arith.constant 0 : index
    %0 = vector.load %arg3[%c0, %c0_0] : memref<1x2048xf32, #tpu.memory_space<vmem>>, vector<1x2048xf32>
    %c0_1 = arith.constant 0 : index
    %c0_2 = arith.constant 0 : index
    %1 = vector.load %arg2[%c0_1, %c0_2] : memref<1x2048xf32, #tpu.memory_space<vmem>>, vector<1x2048xf32>
    %2 = arith.mulf %0, %1 : vector<1x2048xf32>
    %c0_3 = arith.constant 0 : index
    %c0_4 = arith.constant 0 : index
    %c0_5 = arith.constant 0 : index
    %3 = vector.load %arg4[%c0_3, %c0_4, %c0_5] : memref<2x1x2048xf32, #tpu.memory_space<vmem>>, vector<1x1x2048xf32>
    %4 = vector.shape_cast %3 : vector<1x1x2048xf32> to vector<1x2048xf32>
    %5 = vector.shape_cast %2 : vector<1x2048xf32> to vector<1x1x2048xf32>
    tpu.vector_store %arg4[%c0_3, %c0_4, %c0_5], %5 {strides = array<i32>} : memref<2x1x2048xf32, #tpu.memory_space<vmem>>, vector<1x1x2048xf32>,
    %cst = arith.constant 1.000000e+00 : f32
    %6 = vector.broadcast %cst : f32 to vector<1x2048xf32>
    %7 = arith.subf %6, %1 : vector<1x2048xf32>
    %8 = arith.mulf %0, %7 : vector<1x2048xf32>
    %c1 = arith.constant 1 : index
    %c0_6 = arith.constant 0 : index
    %c0_7 = arith.constant 0 : index
    %9 = vector.load %arg4[%c1, %c0_6, %c0_7] : memref<2x1x2048xf32, #tpu.memory_space<vmem>>, vector<1x1x2048xf32>
    %10 = vector.shape_cast %9 : vector<1x1x2048xf32> to vector<1x2048xf32>
    %11 = vector.shape_cast %8 : vector<1x2048xf32> to vector<1x1x2048xf32>
    tpu.vector_store %arg4[%c1, %c0_6, %c0_7], %11 {strides = array<i32>} : memref<2x1x2048xf32, #tpu.memory_space<vmem>>, vector<1x1x2048xf32>,
    return
  }
  func.func @transform_0(%arg0: i32, %arg1: i32) -> (i32, i32) {
    %c0_i32 = arith.constant 0 : i32
    %c0_i32_0 = arith.constant 0 : i32
    return %c0_i32, %arg0 : i32, i32
  }
  func.func @transform_1(%arg0: i32, %arg1: i32) -> (i32, i32) {
    %c0_i32 = arith.constant 0 : i32
    return %arg1, %arg0 : i32, i32
  }
  func.func @transform_2(%arg0: i32, %arg1: i32) -> (i32, i32, i32) {
    %c0_i32 = arith.constant 0 : i32
    %c0_i32_0 = arith.constant 0 : i32
    return %c0_i32, %arg1, %arg0 : i32, i32, i32
  }
}

</mosaic_0001>

<bundles_post_ra>
// kernel: tpu_custom_call.1
= control target key start
LH: loop header
LB: loop body
LE: loop exit
PB: predicated region body
PF: predicated region fallthrough
CT: control target
= control target key end

     0   :  { %7 = vsyncpa [#allocation3], 0  ;;  %s202_s0 = inlined_call_operand.hbm [shape: f32[1,2048], index: 0, kind: input, shape index: {}]   ;;  %s203_s1 = inlined_call_operand.hbm [shape: f32[1,2048], index: 1, kind: input, shape index: {}]   ;;  %s204_s2 = inlined_call_operand.hbm [shape: f32[2,1,2048], index: 2, kind: output, shape index: {}]  }
   0x1   :  { %8 = vsyncpa [#allocation6], 0 }
   0x2   :  { %9 = vsyncpa [#allocation4], 0  ;;  %s146_s9 = smov [#allocation2]   ;;  %s147_s11 = smov [#allocation5]  }
   0x3   :  { %s16_s10 = sshll.u32 %s146_s9, 4  ;;  %s26_s12 = sshll.u32 %s147_s11, 4  ;;  %s17_s10 = int_to_ptr.vmem [resolvable:$true] %s16_s10  ;;  %s27_s12 = int_to_ptr.vmem [resolvable:$true] %s26_s12 }
   0x4   :  { %s74_s15 = scalar_lea.hbm %s202_s0, 256 }
   0x5   :  { %p75_p0 = scmp.ne.s32.totalorder %s202_s0, %s74_s15  ;;  %p78_p1 = scmp.lt.u32.totalorder %s74_s15, %s202_s0 }
   0x7   :  { %p80_p2 = pnand %p78_p1, %p75_p0 }
   0x9   :  { %83 = shalt.err (!%p80_p2)
}
   0xa   :  { %s84_s20 = scalar_lea.vmem %s17_s10, 256  ;;  %p89_p4 = scmp.lt.s32.totalorder %s17_s10, %s17_s10 }
   0xb   :  { %p85_p3 = scmp.ne.s32.totalorder %s17_s10, %s84_s20  ;;  %p90_p5 = scmp.lt.s32.totalorder %s84_s20, %s84_s20 }
   0xd   :  { %p91_p6 = por %p90_p5, %p89_p4 }
   0xf   :  { %p92_p7 = pnand %p91_p6, %p85_p3 }
  0x11   :  { %95 = shalt.err (!%p92_p7)
}
  0x12   :  { %19 = dma.hbm_to_vmem [thread:$0]  %s202_s0, 256, %s17_s10, [#allocation3]  }
  0x13   :  { %s96_s25 = scalar_lea.hbm %s203_s1, 256 }
  0x14   :  { %p97_p8 = scmp.ne.s32.totalorder %s203_s1, %s96_s25  ;;  %p100_p9 = scmp.lt.u32.totalorder %s96_s25, %s203_s1 }
  0x16   :  { %p102_p10 = pnand %p100_p9, %p97_p8 }
  0x18   :  { %105 = shalt.err (!%p102_p10)
}
  0x19   :  { %s106_s30 = scalar_lea.vmem %s27_s12, 256  ;;  %p111_p12 = scmp.lt.s32.totalorder %s27_s12, %s27_s12 }
  0x1a   :  { %p107_p11 = scmp.ne.s32.totalorder %s27_s12, %s106_s30  ;;  %p112_p13 = scmp.lt.s32.totalorder %s106_s30, %s106_s30 }
  0x1c   :  { %p113_p0 = por %p112_p13, %p111_p12 }
  0x1e   :  { %p114_p1 = pnand %p113_p0, %p107_p11 }
  0x20   :  { %117 = shalt.err (!%p114_p1)
}
  0x21   :  { %29 = dma.hbm_to_vmem [thread:$0]  %s203_s1, 256, %s27_s12, [#allocation6]  }
  0x22   :  { %140 = dma.done.wait [#allocation3], 256  }
  0x23   :  { %141 = vsyncadd [#allocation3], 4294967040 }
  0x24   :  { %142 = dma.done.wait [#allocation6], 256  }
  0x25   :  { %143 = vsyncadd [#allocation6], 4294967040  ;;  %v36_v0 = vld [vmem:[#allocation5] sm:$0xff]  ;;  %v38_v1 = vld [vmem:[#allocation2] sm:$0xff]  ;;  %s148_s4 = smov [#allocation7]  }
  0x26   :  { %v37_v2 = vld [vmem:[#allocation5 + $0x8] sm:$0xff]  ;;  %v40_v3 = vmul.f32 %v38_v1, %v36_v0  ;;  %v39_v4 = vld [vmem:[#allocation2 + $0x8] sm:$0xff]  ;;  %v44_v5 = vsub.f32 1.0, %v38_v1  ;;  %s56_s5 = sshll.u32 %s148_s4, 4  ;;  %s57_s5 = int_to_ptr.vmem [resolvable:$true] %s56_s5 }
  0x27   :  { %v41_v6 = vmul.f32 %v39_v4, %v37_v2  ;;  %v45_v7 = vsub.f32 1.0, %v39_v4  ;;  %s118_s1 = scalar_lea.vmem %s57_s5, 512  ;;  %p123_p3 = scmp.lt.s32.totalorder %s57_s5, %s57_s5 }
  0x28   :  { %42 = vst [vmem:[#allocation7] sm:$0xff] %v40_v3  ;;  %v46_v8 = vmul.f32 %v44_v5, %v36_v0  ;;  %p119_p2 = scmp.ne.s32.totalorder %s57_s5, %s118_s1  ;;  %p124_p4 = scmp.lt.s32.totalorder %s118_s1, %s118_s1 }
  0x29   :  { %43 = vst [vmem:[#allocation7 + $0x8] sm:$0xff] %v41_v6  ;;  %v47_v9 = vmul.f32 %v45_v7, %v37_v2 }
  0x2a   :  { %49 = vst [vmem:[#allocation7 + $0x10] sm:$0xff] %v46_v8  ;;  %p125_p5 = por %p124_p4, %p123_p3 }
  0x2b   :  { %50 = vst [vmem:[#allocation7 + $0x18] sm:$0xff] %v47_v9 }
  0x2c   :  { %p126_p6 = pnand %p125_p5, %p119_p2 }
  0x2e   :  { %129 = shalt.err (!%p126_p6)
}
  0x2f   :  { %s130_s8 = scalar_lea.hbm %s204_s2, 512 }
  0x30   :  { %p131_p7 = scmp.ne.s32.totalorder %s204_s2, %s130_s8  ;;  %p134_p8 = scmp.lt.u32.totalorder %s130_s8, %s204_s2 }
  0x32   :  { %p136_p9 = pnand %p134_p8, %p131_p7 }
  0x34   :  { %139 = shalt.err (!%p136_p9)
}
  0x35   :  { %s149_s13 = smov 256   ;;  %s150_s14 = smov 16  }
  0x36   :  { %62 = dma.vmem_to_hbm [thread:$0]  %s57_s5, 512, %s204_s2, [#allocation4], %s149_s13, %s149_s13, %s150_s14  }
  0x37   :  { %144 = dma.done.wait [#allocation4], 512  }
  0x38   :  { %145 = vsyncadd [#allocation4], 4294966784 }
  0x39   :  { %66 = vsyncpa [#allocation3], 1 }
  0x3a   :  { %67 = vsyncpa [#allocation6], 1 }
  0x3b   :  { %68 = vsyncpa [#allocation4], 1 }

</bundles_post_ra>
